<compile_context>
chip_gen: v5e
topology: v5e:2x2
jax: 0.10.0
libtpu: 0.0.40
codegen_flags: <defaults>
</compile_context>

<pallas_src>
import functools

import jax
import jax.numpy as jnp
from jax.experimental import pallas as pl
from jax.experimental.pallas import tpu as pltpu

IN_SIZE = 30
HIDDEN_SIZES = [50, 50, 50]
OUT_SIZE = 1
BN_EPS = 1e-5

NLAYERS = 4
KPAD = 128          # padded feature / hidden width (lane dim)
DEFAULT_BLOCK_B = 512


def _round_up(n, m):
    return ((n + m - 1) // m) * m


def _sigmoid(z):
    # tanh formulation: one EUP op instead of exp + divide.
    return 0.5 * jnp.tanh(0.5 * z) + 0.5


def ffn_kernel(x_ref, w_ref, v_ref, o_ref):
    # x_ref: (TB, 128) f32, columns >= IN_SIZE are zero
    # w_ref: (4, 128, 128) bf16 weight slab (zero padded)
    # v_ref: (8, 128) f32: rows 0..3 = biases b1..b4, row 4 = BN scale, row 5 = BN shift
    # o_ref: (TB, 128) f32, column 0 is the real output

    # BatchNorm folded into a single fused scale/shift (stats hoisted to the wrapper).
    h = x_ref[...] * v_ref[4:5, :] + v_ref[5:6, :]                      # (TB, 128) f32

    for i in range(NLAYERS):                                            # unrolled x4
        z = jnp.dot(h.astype(jnp.bfloat16), w_ref[i],
                    preferred_element_type=jnp.float32) + v_ref[i:i + 1, :]
        h = _sigmoid(z)                                                 # f32 elementwise

    o_ref[...] = h


def ffn_forward(x, params, *, block_b=DEFAULT_BLOCK_B):
    (gamma, beta, w1, b1, w2, b2, w3, b3, w4, b4) = params
    B = x.shape[0]
    xf = x.astype(jnp.float32)

    # --- BatchNorm1d training-mode statistics over the FULL batch (hoisted) ---
    mean = jnp.mean(xf, axis=0, keepdims=True)                          # (1, 30)
    var = jnp.mean(jnp.square(xf - mean), axis=0, keepdims=True)        # biased variance
    scale = gamma * jax.lax.rsqrt(var + BN_EPS)                         # (1, 30)
    shift = beta - mean * scale                                         # (1, 30)

    # --- pack parameters into two pre-padded slabs (2 DMAs instead of 10) ---
    sizes = [IN_SIZE] + HIDDEN_SIZES + [OUT_SIZE]
    ws = (w1, w2, w3, w4)
    bs = (b1, b2, b3, b4)
    w_slab = jnp.zeros((NLAYERS, KPAD, KPAD), jnp.float32)
    v_slab = jnp.zeros((8, KPAD), jnp.float32)
    for i in range(NLAYERS):
        fi, fo = sizes[i], sizes[i + 1]
        w_slab = w_slab.at[i, :fi, :fo].set(ws[i])
        v_slab = v_slab.at[i, :fo].set(bs[i][0])
    v_slab = v_slab.at[4, :IN_SIZE].set(scale[0])
    v_slab = v_slab.at[5, :IN_SIZE].set(shift[0])
    w_slab = w_slab.astype(jnp.bfloat16)                                # MXU-native inputs

    # --- pad x: lane-dense 128 features, batch padded to a multiple of the tile ---
    tb = min(block_b, max(8, _round_up(B, 8)))
    bp = _round_up(max(B, tb), tb)
    x_pad = jnp.zeros((bp, KPAD), jnp.float32).at[:B, :IN_SIZE].set(xf)

    out = pl.pallas_call(
        ffn_kernel,
        out_shape=jax.ShapeDtypeStruct((bp, KPAD), jnp.float32),
        grid_spec=pltpu.PrefetchScalarGridSpec(
            num_scalar_prefetch=0,
            grid=(bp // tb,),
            in_specs=[
                pl.BlockSpec((tb, KPAD), lambda i: (i, 0)),             # x: tiled over batch
                pl.BlockSpec((NLAYERS, KPAD, KPAD), lambda i: (0, 0, 0)),  # weights: resident
                pl.BlockSpec((8, KPAD), lambda i: (0, 0)),              # biases/BN: resident
            ],
            out_specs=pl.BlockSpec((tb, KPAD), lambda i: (i, 0)),       # lane-dense output
        ),
        compiler_params=pltpu.CompilerParams(
            dimension_semantics=("parallel",)),
    )(x_pad, w_slab, v_slab)

    return out[:B, :OUT_SIZE]


def init_params(key):
    """Deterministic init; Linear weights ~ U(-1/sqrt(fan_in), 1/sqrt(fan_in))."""
    layer_sizes = [IN_SIZE] + HIDDEN_SIZES + [OUT_SIZE]
    gamma = jnp.ones((1, IN_SIZE), jnp.float32)   # BN weight
    beta = jnp.zeros((1, IN_SIZE), jnp.float32)   # BN bias
    params = [gamma, beta]
    for i in range(1, len(layer_sizes)):
        fan_in, fan_out = layer_sizes[i - 1], layer_sizes[i]
        key, kw, kb = jax.random.split(key, 3)
        bound = 1.0 / jnp.sqrt(float(fan_in))
        w = jax.random.uniform(kw, (fan_in, fan_out), jnp.float32, -bound, bound)
        b = jax.random.uniform(kb, (1, fan_out), jnp.float32, -bound, bound)
        params += [w, b]
    return tuple(params)


def ffn_reference(x, params):
    """Pure f32 reference matching the PyTorch module (BN training mode)."""
    (gamma, beta, w1, b1, w2, b2, w3, b3, w4, b4) = params
    mean = jnp.mean(x, axis=0, keepdims=True)
    var = jnp.mean(jnp.square(x - mean), axis=0, keepdims=True)
    h = (x - mean) * jax.lax.rsqrt(var + BN_EPS) * gamma + beta
    for w, b in ((w1, b1), (w2, b2), (w3, b3), (w4, b4)):
        h = jax.nn.sigmoid(h @ w + b)
    return h


if __name__ == "__main__":
    key = jax.random.PRNGKey(0)
    key, kx = jax.random.split(key)
    B = 8
    x = jax.random.normal(kx, (B, IN_SIZE), jnp.float32)
    params = init_params(key)

    fwd = jax.jit(functools.partial(ffn_forward, block_b=DEFAULT_BLOCK_B))
    out = fwd(x, params)
    jax.block_until_ready(out)

    ref = ffn_reference(x, params)
    assert out.shape == (B, OUT_SIZE), out.shape
    # bf16 MXU inputs (f32 accumulation) => allow small rounding vs the f32 reference.
    assert jnp.allclose(out, ref, atol=5e-3, rtol=1e-3), (out, ref)

    print("KERNEL_OK")
</pallas_src>

<mosaic_0001>
module attributes {stable_mosaic.version = 11 : i64} {
  func.func @ffn_kernel(%arg0: i32, %arg1: memref<8x128xf32, #tpu.memory_space<vmem>>, %arg2: memref<4x128x128xbf16, #tpu.memory_space<vmem>>, %arg3: memref<8x128xf32, #tpu.memory_space<vmem>>, %arg4: memref<8x128xf32, #tpu.memory_space<vmem>>) attributes {dimension_semantics = [#tpu.dimension_semantics<parallel>], iteration_bounds = array<i64: 1>, scalar_prefetch = 0 : i64, scratch_operands = 0 : i64, tpu.core_type = #tpu.core_type<tc>, window_params = [{transform_indices = @transform_0, window_bounds = array<i64: 8, 128>}, {pipeline_mode = #tpu.pipeline_mode<synchronous>, transform_indices = @transform_1, window_bounds = array<i64: 4, 128, 128>}, {pipeline_mode = #tpu.pipeline_mode<synchronous>, transform_indices = @transform_2, window_bounds = array<i64: 8, 128>}, {transform_indices = @transform_3, window_bounds = array<i64: 8, 128>}]} {
    %c0 = arith.constant 0 : index
    %c0_0 = arith.constant 0 : index
    %0 = vector.load %arg1[%c0, %c0_0] : memref<8x128xf32, #tpu.memory_space<vmem>>, vector<8x128xf32>
    %c4 = arith.constant 4 : index
    %c0_1 = arith.constant 0 : index
    %1 = vector.load %arg3[%c4, %c0_1] : memref<8x128xf32, #tpu.memory_space<vmem>>, vector<1x128xf32>
    %2 = vector.broadcast %1 : vector<1x128xf32> to vector<8x128xf32>
    %3 = arith.mulf %0, %2 : vector<8x128xf32>
    %c5 = arith.constant 5 : index
    %c0_2 = arith.constant 0 : index
    %4 = vector.load %arg3[%c5, %c0_2] : memref<8x128xf32, #tpu.memory_space<vmem>>, vector<1x128xf32>
    %5 = vector.broadcast %4 : vector<1x128xf32> to vector<8x128xf32>
    %6 = arith.addf %3, %5 : vector<8x128xf32>
    %7 = arith.truncf %6 : vector<8x128xf32> to vector<8x128xbf16>
    %c0_3 = arith.constant 0 : index
    %c0_4 = arith.constant 0 : index
    %c0_5 = arith.constant 0 : index
    %8 = vector.load %arg2[%c0_3, %c0_4, %c0_5] : memref<4x128x128xbf16, #tpu.memory_space<vmem>>, vector<1x128x128xbf16>
    %9 = vector.shape_cast %8 : vector<1x128x128xbf16> to vector<128x128xbf16>
    %cst = arith.constant dense<0.000000e+00> : vector<8x128xf32>
    %10 = tpu.matmul %7, %9, %cst {dimension_numbers = #tpu.dot_dimension_numbers<[1], [0], [0], [1], [0, 0, 1, 1], [], []>} : vector<8x128xbf16>, vector<128x128xbf16>, vector<8x128xf32> -> vector<8x128xf32>
    %c0_6 = arith.constant 0 : index
    %c0_7 = arith.constant 0 : index
    %11 = vector.load %arg3[%c0_6, %c0_7] : memref<8x128xf32, #tpu.memory_space<vmem>>, vector<1x128xf32>
    %12 = vector.broadcast %11 : vector<1x128xf32> to vector<8x128xf32>
    %13 = arith.addf %10, %12 : vector<8x128xf32>
    %cst_8 = arith.constant 5.000000e-01 : f32
    %14 = vector.broadcast %cst_8 : f32 to vector<8x128xf32>
    %15 = arith.mulf %14, %13 : vector<8x128xf32>
    %16 = math.tanh %15 : vector<8x128xf32>
    %cst_9 = arith.constant 5.000000e-01 : f32
    %17 = vector.broadcast %cst_9 : f32 to vector<8x128xf32>
    %18 = arith.mulf %17, %16 : vector<8x128xf32>
    %cst_10 = arith.constant 5.000000e-01 : f32
    %19 = vector.broadcast %cst_10 : f32 to vector<8x128xf32>
    %20 = arith.addf %18, %19 : vector<8x128xf32>
    %21 = arith.truncf %20 : vector<8x128xf32> to vector<8x128xbf16>
    %c1 = arith.constant 1 : index
    %c0_11 = arith.constant 0 : index
    %c0_12 = arith.constant 0 : index
    %22 = vector.load %arg2[%c1, %c0_11, %c0_12] : memref<4x128x128xbf16, #tpu.memory_space<vmem>>, vector<1x128x128xbf16>
    %23 = vector.shape_cast %22 : vector<1x128x128xbf16> to vector<128x128xbf16>
    %cst_13 = arith.constant dense<0.000000e+00> : vector<8x128xf32>
    %24 = tpu.matmul %21, %23, %cst_13 {dimension_numbers = #tpu.dot_dimension_numbers<[1], [0], [0], [1], [0, 0, 1, 1], [], []>} : vector<8x128xbf16>, vector<128x128xbf16>, vector<8x128xf32> -> vector<8x128xf32>
    %c1_14 = arith.constant 1 : index
    %c0_15 = arith.constant 0 : index
    %25 = vector.load %arg3[%c1_14, %c0_15] : memref<8x128xf32, #tpu.memory_space<vmem>>, vector<1x128xf32>
    %26 = vector.broadcast %25 : vector<1x128xf32> to vector<8x128xf32>
    %27 = arith.addf %24, %26 : vector<8x128xf32>
    %cst_16 = arith.constant 5.000000e-01 : f32
    %28 = vector.broadcast %cst_16 : f32 to vector<8x128xf32>
    %29 = arith.mulf %28, %27 : vector<8x128xf32>
    %30 = math.tanh %29 : vector<8x128xf32>
    %cst_17 = arith.constant 5.000000e-01 : f32
    %31 = vector.broadcast %cst_17 : f32 to vector<8x128xf32>
    %32 = arith.mulf %31, %30 : vector<8x128xf32>
    %cst_18 = arith.constant 5.000000e-01 : f32
    %33 = vector.broadcast %cst_18 : f32 to vector<8x128xf32>
    %34 = arith.addf %32, %33 : vector<8x128xf32>
    %35 = arith.truncf %34 : vector<8x128xf32> to vector<8x128xbf16>
    %c2 = arith.constant 2 : index
    %c0_19 = arith.constant 0 : index
    %c0_20 = arith.constant 0 : index
    %36 = vector.load %arg2[%c2, %c0_19, %c0_20] : memref<4x128x128xbf16, #tpu.memory_space<vmem>>, vector<1x128x128xbf16>
    %37 = vector.shape_cast %36 : vector<1x128x128xbf16> to vector<128x128xbf16>
    %cst_21 = arith.constant dense<0.000000e+00> : vector<8x128xf32>
    %38 = tpu.matmul %35, %37, %cst_21 {dimension_numbers = #tpu.dot_dimension_numbers<[1], [0], [0], [1], [0, 0, 1, 1], [], []>} : vector<8x128xbf16>, vector<128x128xbf16>, vector<8x128xf32> -> vector<8x128xf32>
    %c2_22 = arith.constant 2 : index
    %c0_23 = arith.constant 0 : index
    %39 = vector.load %arg3[%c2_22, %c0_23] : memref<8x128xf32, #tpu.memory_space<vmem>>, vector<1x128xf32>
    %40 = vector.broadcast %39 : vector<1x128xf32> to vector<8x128xf32>
    %41 = arith.addf %38, %40 : vector<8x128xf32>
    %cst_24 = arith.constant 5.000000e-01 : f32
    %42 = vector.broadcast %cst_24 : f32 to vector<8x128xf32>
    %43 = arith.mulf %42, %41 : vector<8x128xf32>
    %44 = math.tanh %43 : vector<8x128xf32>
    %cst_25 = arith.constant 5.000000e-01 : f32
    %45 = vector.broadcast %cst_25 : f32 to vector<8x128xf32>
    %46 = arith.mulf %45, %44 : vector<8x128xf32>
    %cst_26 = arith.constant 5.000000e-01 : f32
    %47 = vector.broadcast %cst_26 : f32 to vector<8x128xf32>
    %48 = arith.addf %46, %47 : vector<8x128xf32>
    %49 = arith.truncf %48 : vector<8x128xf32> to vector<8x128xbf16>
    %c3 = arith.constant 3 : index
    %c0_27 = arith.constant 0 : index
    %c0_28 = arith.constant 0 : index
    %50 = vector.load %arg2[%c3, %c0_27, %c0_28] : memref<4x128x128xbf16, #tpu.memory_space<vmem>>, vector<1x128x128xbf16>
    %51 = vector.shape_cast %50 : vector<1x128x128xbf16> to vector<128x128xbf16>
    %cst_29 = arith.constant dense<0.000000e+00> : vector<8x128xf32>
    %52 = tpu.matmul %49, %51, %cst_29 {dimension_numbers = #tpu.dot_dimension_numbers<[1], [0], [0], [1], [0, 0, 1, 1], [], []>} : vector<8x128xbf16>, vector<128x128xbf16>, vector<8x128xf32> -> vector<8x128xf32>
    %c3_30 = arith.constant 3 : index
    %c0_31 = arith.constant 0 : index
    %53 = vector.load %arg3[%c3_30, %c0_31] : memref<8x128xf32, #tpu.memory_space<vmem>>, vector<1x128xf32>
    %54 = vector.broadcast %53 : vector<1x128xf32> to vector<8x128xf32>
    %55 = arith.addf %52, %54 : vector<8x128xf32>
    %cst_32 = arith.constant 5.000000e-01 : f32
    %56 = vector.broadcast %cst_32 : f32 to vector<8x128xf32>
    %57 = arith.mulf %56, %55 : vector<8x128xf32>
    %58 = math.tanh %57 : vector<8x128xf32>
    %cst_33 = arith.constant 5.000000e-01 : f32
    %59 = vector.broadcast %cst_33 : f32 to vector<8x128xf32>
    %60 = arith.mulf %59, %58 : vector<8x128xf32>
    %cst_34 = arith.constant 5.000000e-01 : f32
    %61 = vector.broadcast %cst_34 : f32 to vector<8x128xf32>
    %62 = arith.addf %60, %61 : vector<8x128xf32>
    %c0_35 = arith.constant 0 : index
    %c0_36 = arith.constant 0 : index
    %63 = vector.load %arg4[%c0_35, %c0_36] : memref<8x128xf32, #tpu.memory_space<vmem>>, vector<8x128xf32>
    tpu.vector_store %arg4[%c0_35, %c0_36], %62 {strides = array<i32>} : memref<8x128xf32, #tpu.memory_space<vmem>>, vector<8x128xf32>,
    return
  }
  func.func @transform_0(%arg0: i32) -> (i32, i32) {
    %c0_i32 = arith.constant 0 : i32
    %c0_i32_0 = arith.constant 0 : i32
    return %arg0, %c0_i32 : i32, i32
  }
  func.func @transform_1(%arg0: i32) -> (i32, i32, i32) {
    %c0_i32 = arith.constant 0 : i32
    %c0_i32_0 = arith.constant 0 : i32
    %c0_i32_1 = arith.constant 0 : i32
    %c0_i32_2 = arith.constant 0 : i32
    return %c0_i32, %c0_i32_0, %c0_i32_1 : i32, i32, i32
  }
  func.func @transform_2(%arg0: i32) -> (i32, i32) {
    %c0_i32 = arith.constant 0 : i32
    %c0_i32_0 = arith.constant 0 : i32
    %c0_i32_1 = arith.constant 0 : i32
    return %c0_i32, %c0_i32_0 : i32, i32
  }
  func.func @transform_3(%arg0: i32) -> (i32, i32) {
    %c0_i32 = arith.constant 0 : i32
    %c0_i32_0 = arith.constant 0 : i32
    return %arg0, %c0_i32 : i32, i32
  }
}

</mosaic_0001>

<bundles_post_ra>
// kernel: ffn_forward.1
= control target key start
LH: loop header
LB: loop body
LE: loop exit
PB: predicated region body
PF: predicated region fallthrough
CT: control target
= control target key end

     0   :  { %s727_s1 = inlined_call_operand.vmem [shape: bf16[4,128,128], index: 1, kind: input, shape index: {}]   ;;  %s728_s2 = inlined_call_operand.vmem [shape: f32[8,128], index: 2, kind: input, shape index: {}]   ;;  %s729_s0 = inlined_call_operand.vmem [shape: f32[8,128], index: 0, kind: input, shape index: {}]   ;;  %s730_s3 = inlined_call_operand.vmem [shape: f32[8,128], index: 3, kind: output, shape index: {}]  }
   0x1   :  { %v548_v0 = vld [vmem:[%s727_s1 + $0x38] sm:$0xff]  ;;  %v547_v1 = vld [vmem:[%s727_s1 + $0x30] sm:$0xff]  ;;  %v546_v3 = vld [vmem:[%s727_s1 + $0x28] sm:$0xff] }
   0x2   :  { %88 = vmatpush.bf16.msra.mxu0 %v548_v0  ;;  %v556_v2 = vld [vmem:[%s727_s1 + $0x78] sm:$0xff]  ;;  %v555_v4 = vld [vmem:[%s727_s1 + $0x70] sm:$0xff]  ;;  %v545_v5 = vld [vmem:[%s727_s1 + $0x20] sm:$0xff] }
   0x3   :  { %173 = vmatpush.bf16.msra.mxu1 %v556_v2  ;;  %v554_v6 = vld [vmem:[%s727_s1 + $0x68] sm:$0xff]  ;;  %v544_v7 = vld [vmem:[%s727_s1 + $0x18] sm:$0xff]  ;;  %v553_v8 = vld [vmem:[%s727_s1 + $0x60] sm:$0xff] }
   0x4   :  { %v573_v9 = vld [vmem:[%s728_s2 + $0x4] ss:$0 sm:$0xff]  ;;  %v543_v10 = vld [vmem:[%s727_s1 + $0x10] sm:$0xff]  ;;  %v574_v13 = vld [vmem:[%s728_s2 + $0x5] ss:$0 sm:$0xff] }
   0x5   :  { %v14_v11 = vld [vmem:[%s729_s0] sm:$0xff]  ;;  %v542_v14 = vld [vmem:[%s727_s1 + $0x8] sm:$0xff]  ;;  %v552_v18 = vld [vmem:[%s727_s1 + $0x58] sm:$0xff] }
   0x6   :  { %89 = vmatpush.bf16.msra.mxu0 %v547_v1  ;;  %v17_v12 = vmul.f32 %v573_v9, %v14_v11  ;;  %v541_v16 = vld [vmem:[%s727_s1] sm:$0xff]  ;;  %v551_v19 = vld [vmem:[%s727_s1 + $0x50] sm:$0xff]  ;;  %v550_v20 = vld [vmem:[%s727_s1 + $0x48] sm:$0xff] }
   0x7   :  { %174 = vmatpush.bf16.msra.mxu1 %v555_v4  ;;  %v549_v21 = vld [vmem:[%s727_s1 + $0x40] sm:$0xff]  ;;  %v564_v22 = vld [vmem:[%s727_s1 + $0xb8] sm:$0xff]  ;;  %v563_v23 = vld [vmem:[%s727_s1 + $0xb0] sm:$0xff] }
   0x8   :  { %v20_v15 = vadd.f32 %v574_v13, %v17_v12  ;;  %258 = vmatpush.bf16.msra.mxu2 %v564_v22  ;;  %v562_v24 = vld [vmem:[%s727_s1 + $0xa8] sm:$0xff]  ;;  %v561_v25 = vld [vmem:[%s727_s1 + $0xa0] sm:$0xff]  ;;  %v560_v35 = vld [vmem:[%s727_s1 + $0x98] sm:$0xff] }
   0x9   :  { %v575_v26 = vld [vmem:[%s728_s2] ss:$0 sm:$0xff]  ;;  %v559_v36 = vld [vmem:[%s727_s1 + $0x90] sm:$0xff]  ;;  %v558_v37 = vld [vmem:[%s727_s1 + $0x88] sm:$0xff] }
   0xa   :  { %90 = vmatpush.bf16.msra.mxu0 %v546_v3  ;;  %v21_v17 = vpack.c.bf16 %v20_v15, %v20_v15  ;;  %v557_v38 = vld [vmem:[%s727_s1 + $0x80] sm:$0xff]  ;;  %v572_v39 = vld [vmem:[%s727_s1 + $0xf8] sm:$0xff]  ;;  %v571_v40 = vld [vmem:[%s727_s1 + $0xf0] sm:$0xff] }
   0xb   :  { %175 = vmatpush.bf16.msra.mxu1 %v554_v6  ;;  %343 = vmatpush.bf16.msra.mxu3 %v572_v39  ;;  %v570_v41 = vld [vmem:[%s727_s1 + $0xe8] sm:$0xff]  ;;  %v569_v42 = vld [vmem:[%s727_s1 + $0xe0] sm:$0xff]  ;;  %v568_v52 = vld [vmem:[%s727_s1 + $0xd8] sm:$0xff] }
   0xc   :  { %259 = vmatpush.bf16.msra.mxu2 %v563_v23  ;;  %v576_v43 = vld [vmem:[%s728_s2 + $0x1] ss:$0 sm:$0xff]  ;;  %v567_v53 = vld [vmem:[%s727_s1 + $0xd0] sm:$0xff]  ;;  %v566_v54 = vld [vmem:[%s727_s1 + $0xc8] sm:$0xff] }
   0xd   :  { %v565_v55 = vld [vmem:[%s727_s1 + $0xc0] sm:$0xff] }
   0xe   :  { %91 = vmatpush.bf16.msra.mxu0 %v545_v5  ;;  %v577_v56 = vld [vmem:[%s728_s2 + $0x2] ss:$0 sm:$0xff]  ;;  %v578_v1 = vld [vmem:[%s728_s2 + $0x3] ss:$0 sm:$0xff] }
   0xf   :  { %176 = vmatpush.bf16.msra.mxu1 %v553_v8  ;;  %344 = vmatpush.bf16.msra.mxu3 %v571_v40 }
  0x10   :  { %260 = vmatpush.bf16.msra.mxu2 %v562_v24 }
  0x12   :  { %92 = vmatpush.bf16.msra.mxu0 %v544_v7 }
  0x13   :  { %177 = vmatpush.bf16.msra.mxu1 %v552_v18  ;;  %345 = vmatpush.bf16.msra.mxu3 %v570_v41 }
  0x14   :  { %261 = vmatpush.bf16.msra.mxu2 %v561_v25 }
  0x16   :  { %93 = vmatpush.bf16.msra.mxu0 %v543_v10 }
  0x17   :  { %178 = vmatpush.bf16.msra.mxu1 %v551_v19  ;;  %346 = vmatpush.bf16.msra.mxu3 %v569_v42 }
  0x18   :  { %262 = vmatpush.bf16.msra.mxu2 %v560_v35 }
  0x1a   :  { %94 = vmatpush.bf16.msra.mxu0 %v542_v14 }
  0x1b   :  { %179 = vmatpush.bf16.msra.mxu1 %v550_v20  ;;  %347 = vmatpush.bf16.msra.mxu3 %v568_v52 }
  0x1c   :  { %263 = vmatpush.bf16.msra.mxu2 %v559_v36 }
  0x1e   :  { %95 = vmatpush.bf16.msra.mxu0 %v541_v16 }
  0x1f   :  { %180 = vmatpush.bf16.msra.mxu1 %v549_v21  ;;  %348 = vmatpush.bf16.msra.mxu3 %v567_v53 }
  0x20   :  { %264 = vmatpush.bf16.msra.mxu2 %v558_v37 }
  0x21   :  { %96 = vmatmul.bf16.vlgmr.msra.gmra.mxu0 %v21_v17 }
  0x23   :  { %349 = vmatpush.bf16.msra.mxu3 %v566_v54 }
  0x24   :  { %265 = vmatpush.bf16.msra.mxu2 %v557_v38 }
  0x27   :  { %350 = vmatpush.bf16.msra.mxu3 %v565_v55 }
  0x9e   :  { %v97_v27 = vpop.f32.mrf.mxu0 }
  0x9f   :  { %v98_v28 = vadd.f32 %v575_v26, %v97_v27 }
  0xa1   :  { %v101_v29 = vmul.f32 0.5, %v98_v28 }
  0xa3   :  { %579 = vtanh.f32 %v101_v29 }
  0xa6   :  { %v99_v30 = vpop.f32.mrf.mxu0 }
  0xa9   :  { %v580_v31 = vpop.eup %579 }
  0xaa   :  { %v103_v32 = vmul.f32 0.5, %v580_v31 }
  0xac   :  { %v104_v33 = vadd.f32 0.5, %v103_v32 }
  0xae   :  { %v105_v34 = vpack.c.bf16 %v104_v33, %v104_v33 }
  0xb0   :  { %181 = vmatmul.bf16.vlgmr.msra.gmra.mxu1 %v105_v34 }
 0x12d   :  { %v182_v44 = vpop.f32.mrf.mxu1 }
 0x12e   :  { %v183_v45 = vadd.f32 %v576_v43, %v182_v44 }
 0x130   :  { %v186_v46 = vmul.f32 0.5, %v183_v45 }
 0x132   :  { %581 = vtanh.f32 %v186_v46 }
 0x135   :  { %v184_v47 = vpop.f32.mrf.mxu1 }
 0x138   :  { %v582_v48 = vpop.eup %581 }
 0x139   :  { %v188_v49 = vmul.f32 0.5, %v582_v48 }
 0x13b   :  { %v189_v50 = vadd.f32 0.5, %v188_v49 }
 0x13d   :  { %v190_v51 = vpack.c.bf16 %v189_v50, %v189_v50 }
 0x13f   :  { %266 = vmatmul.bf16.vlgmr.msra.gmra.mxu2 %v190_v51 }
 0x1c2   :  { %v267_v57 = vpop.f32.mrf.mxu2 }
 0x1c3   :  { %v268_v58 = vadd.f32 %v577_v56, %v267_v57 }
 0x1c5   :  { %v271_v59 = vmul.f32 0.5, %v268_v58 }
 0x1c7   :  { %583 = vtanh.f32 %v271_v59 }
 0x1ca   :  { %v269_v60 = vpop.f32.mrf.mxu2 }
 0x1cd   :  { %v584_v61 = vpop.eup %583 }
 0x1ce   :  { %v273_v62 = vmul.f32 0.5, %v584_v61 }
 0x1d0   :  { %v274_v63 = vadd.f32 0.5, %v273_v62 }
 0x1d2   :  { %v275_v0 = vpack.c.bf16 %v274_v63, %v274_v63 }
 0x1d4   :  { %351 = vmatmul.bf16.vlgmr.msra.gmra.mxu3 %v275_v0 }
 0x257   :  { %v352_v2 = vpop.f32.mrf.mxu3 }
 0x258   :  { %v353_v3 = vadd.f32 %v578_v1, %v352_v2 }
 0x25a   :  { %v356_v4 = vmul.f32 0.5, %v353_v3 }
 0x25c   :  { %585 = vtanh.f32 %v356_v4 }
 0x25f   :  { %v354_v5 = vpop.f32.mrf.mxu3 }
 0x262   :  { %v586_v6 = vpop.eup %585 }
 0x263   :  { %v358_v7 = vmul.f32 0.5, %v586_v6 }
 0x265   :  { %v359_v8 = vadd.f32 0.5, %v358_v7 }
 0x267   :  { %360 = vst [vmem:[%s730_s3] sm:$0xff] %v359_v8 }

</bundles_post_ra>
